<compile_context>
chip_gen: v7x
topology: tpu7x:2x2x1
jax: 0.10.0
libtpu: 0.0.40
codegen_flags: <defaults>
</compile_context>

<pallas_src>
import functools
import jax
import jax.numpy as jnp
from jax.experimental import pallas as pl
from jax.experimental.pallas import tpu as pltpu

LANE = 128
_BN_EPS = 1e-5
_MAX_TILE_ROWS = 4096                  # activation rows per grid step (cap)
_VMEM_BUDGET = 20 * 1024 * 1024        # per-step working-set estimate
_VMEM_LIMIT_BYTES = 40 * 1024 * 1024   # explicit scoped-VMEM limit (< v7x 64 MiB)

_MOSAIC_PARAMS = pltpu.CompilerParams(
    dimension_semantics=("parallel",),
    vmem_limit_bytes=_VMEM_LIMIT_BYTES)


def _round_up(x, m):
    return (x + m - 1) // m * m


# -----------------------------------------------------------------------------
# Plain-JAX glue: sampling / grouping (data-dependent sort + gather).
# -----------------------------------------------------------------------------
def square_distance(src, dst):
    dist = -2.0 * jnp.matmul(src, jnp.swapaxes(dst, 1, 2))
    dist = dist + jnp.sum(src ** 2, axis=-1)[:, :, None]
    dist = dist + jnp.sum(dst ** 2, axis=-1)[:, None, :]
    return dist


def index_points(points, idx):
    B = points.shape[0]
    idx_shape = idx.shape
    idx_flat = idx.reshape(B, -1)
    gathered = jnp.take_along_axis(points, idx_flat[..., None], axis=1)
    return gathered.reshape(*idx_shape, points.shape[-1])


def farthest_point_sample(xyz, npoint):
    # NOTE: the PyTorch reference seeds with torch.randint; we use start index 0
    # for reproducibility (functional divergence from the torch model).
    B, N, _ = xyz.shape
    batch_idx = jnp.arange(B)

    def body(i, carry):
        distance, farthest, centroids = carry
        centroids = centroids.at[:, i].set(farthest)
        centroid = xyz[batch_idx, farthest, :][:, None, :]            # [B,1,3]
        dist = jnp.sum((xyz - centroid) ** 2, axis=-1)                 # [B,N]
        distance = jnp.minimum(distance, dist)
        farthest = jnp.argmax(distance, axis=-1).astype(jnp.int32)
        return distance, farthest, centroids

    init = (jnp.full((B, N), 1e10, jnp.float32),
            jnp.zeros((B,), jnp.int32),
            jnp.zeros((B, npoint), jnp.int32))
    _, _, centroids = jax.lax.fori_loop(0, npoint, body, init)
    return centroids


def query_ball_point(radius, nsample, xyz, new_xyz):
    B, N, _ = xyz.shape
    S = new_xyz.shape[1]
    sqrdists = square_distance(new_xyz, xyz)                           # [B,S,N]
    group_idx = jnp.broadcast_to(jnp.arange(N, dtype=jnp.int32), (B, S, N))
    group_idx = jnp.where(sqrdists > radius ** 2, N, group_idx)
    group_idx = jnp.sort(group_idx, axis=-1)[:, :, :nsample]
    group_first = group_idx[:, :, :1]
    group_idx = jnp.where(group_idx == N, group_first, group_idx)
    return group_idx


def sample_and_group(npoint, radius, nsample, xyz, points):
    B, N, C = xyz.shape
    fps_idx = farthest_point_sample(xyz, npoint)                       # [B,S]
    new_xyz = index_points(xyz, fps_idx)                               # [B,S,3]
    idx = query_ball_point(radius, nsample, xyz, new_xyz)              # [B,S,ns]
    grouped_xyz = index_points(xyz, idx)                               # [B,S,ns,3]
    grouped_xyz_norm = grouped_xyz - new_xyz[:, :, None, :]
    if points is not None:
        grouped_points = index_points(points, idx)                     # [B,S,ns,D]
        new_points = jnp.concatenate([grouped_xyz_norm, grouped_points], axis=-1)
    else:
        new_points = grouped_xyz_norm
    return new_xyz, new_points


def sample_and_group_all(xyz, points):
    B, N, C = xyz.shape
    new_xyz = jnp.zeros((B, 1, C), dtype=xyz.dtype)
    grouped_xyz = xyz.reshape(B, 1, N, C)
    if points is not None:
        new_points = jnp.concatenate(
            [grouped_xyz, points.reshape(B, 1, N, -1)], axis=-1)
    else:
        new_points = grouped_xyz
    return new_xyz, new_points


# -----------------------------------------------------------------------------
# Pallas kernels.
#
# Activations are lane-dense 2-D slabs [R, C] with R = B*S*nsample; all C
# except the layer-0 input are padded to multiples of 128.  Each pallas_call
# tiles R into tr = tg*nsample rows over a "parallel" 1-D grid; Pallas
# double-buffers the HBM<->VMEM DMAs.  Inter-layer slabs are bf16.
# -----------------------------------------------------------------------------
def _write_stats(o, stats_ref):
    """stats block (1, 2, C): row 0 = column sums, row 1 = column sums of squares."""
    psum = jnp.sum(o, axis=0, keepdims=True)
    psq = jnp.sum(o * o, axis=0, keepdims=True)
    stats_ref[...] = jnp.concatenate([psum, psq], axis=0)[None]


def _mm_stats_kernel(x_ref, w_ref, y_ref, stats_ref):
    """Layer 0: y = x @ w (bf16 MXU, f32 acc), bf16 slab out + f32 partial stats."""
    o = jnp.dot(x_ref[...], w_ref[...], preferred_element_type=jnp.float32)
    y_ref[...] = o.astype(jnp.bfloat16)
    _write_stats(o, stats_ref)


def _bn_mm_stats_kernel(y_ref, scale_ref, shift_ref, w_ref, o_ref, stats_ref):
    """Middle layers: h = relu(y*scale + shift) (f32); o = h @ w; bf16 out + stats."""
    h = jnp.maximum(
        y_ref[...].astype(jnp.float32) * scale_ref[...] + shift_ref[...], 0.0)
    o = jnp.dot(h.astype(jnp.bfloat16), w_ref[...],
                preferred_element_type=jnp.float32)
    o_ref[...] = o.astype(jnp.bfloat16)
    _write_stats(o, stats_ref)


def _bn_mm_pool_kernel(y_ref, scale_ref, shift_ref, w_ref,
                       stats_ref, max_ref, min_ref, *, nsample):
    """Last layer: prev BN+ReLU, matmul, then per-group raw max/min of o.
    The full (R, C_last) slab is never written to HBM; the final BN+ReLU+max
    is recovered outside from (max, min, stats) since relu(a*x+b) is monotone
    per sign of a."""
    h = jnp.maximum(
        y_ref[...].astype(jnp.float32) * scale_ref[...] + shift_ref[...], 0.0)
    o = jnp.dot(h.astype(jnp.bfloat16), w_ref[...],
                preferred_element_type=jnp.float32)
    _write_stats(o, stats_ref)
    tr, c = o.shape
    og = o.reshape(tr // nsample, nsample, c)
    max_ref[...] = jnp.max(og, axis=1)[None]
    min_ref[...] = jnp.min(og, axis=1)[None]


# -----------------------------------------------------------------------------
# pallas_call wrappers.
# -----------------------------------------------------------------------------
def _pick_group_tile(n_groups, ns, layer_dims):
    """Groups per tile: divides n_groups, keeps >=2 tiles when possible, fits
    the per-step VMEM working set (double-buffered activations + weight +
    stats/pool blocks)."""
    def step_bytes(tg):
        rows = tg * ns
        worst = 0
        for cin, cout in layer_dims:
            act = rows * (cin + cout) * 2 * 2           # bf16 in/out, double-buffered
            wgt = cin * cout * 2 * 2                     # bf16 weight, double-buffered
            aux = (2 * cout + 2 * tg * cout) * 4 * 2     # f32 stats + pool max/min
            worst = max(worst, act + wgt + aux)
        return worst

    cap = max(1, _MAX_TILE_ROWS // max(ns, 1))
    if n_groups >= 2:
        cap = min(cap, n_groups // 2)      # >=2 grid tiles -> both v7x TCs busy
    for cand in range(min(cap, n_groups), 0, -1):
        if n_groups % cand:
            continue
        if (cand * ns) % 16:               # bf16-friendly sublane-aligned tiles
            continue
        if step_bytes(cand) <= _VMEM_BUDGET:
            return cand
    # TODO(synk): a huge single group (group_all with very large N) would need
    # the nsample axis tiled with a running max/min accumulator; fall back to
    # one whole-array tile at these sizes.
    return n_groups


def _mm_stats_call(x, w, tr):
    R, cin = x.shape
    cout = w.shape[1]
    n_tiles = R // tr
    return pl.pallas_call(
        _mm_stats_kernel,
        grid=(n_tiles,),
        in_specs=[pl.BlockSpec((tr, cin), lambda i: (i, 0)),
                  pl.BlockSpec((cin, cout), lambda i: (0, 0))],
        out_specs=(pl.BlockSpec((tr, cout), lambda i: (i, 0)),
                   pl.BlockSpec((1, 2, cout), lambda i: (i, 0, 0))),
        out_shape=(jax.ShapeDtypeStruct((R, cout), jnp.bfloat16),
                   jax.ShapeDtypeStruct((n_tiles, 2, cout), jnp.float32)),
        compiler_params=_MOSAIC_PARAMS,
    )(x, w)


def _bn_mm_stats_call(y_prev, scale, shift, w, tr):
    R, cin = y_prev.shape
    cout = w.shape[1]
    n_tiles = R // tr
    return pl.pallas_call(
        _bn_mm_stats_kernel,
        grid=(n_tiles,),
        in_specs=[pl.BlockSpec((tr, cin), lambda i: (i, 0)),
                  pl.BlockSpec((1, cin), lambda i: (0, 0)),
                  pl.BlockSpec((1, cin), lambda i: (0, 0)),
                  pl.BlockSpec((cin, cout), lambda i: (0, 0))],
        out_specs=(pl.BlockSpec((tr, cout), lambda i: (i, 0)),
                   pl.BlockSpec((1, 2, cout), lambda i: (i, 0, 0))),
        out_shape=(jax.ShapeDtypeStruct((R, cout), jnp.bfloat16),
                   jax.ShapeDtypeStruct((n_tiles, 2, cout), jnp.float32)),
        compiler_params=_MOSAIC_PARAMS,
    )(y_prev, scale, shift, w)


def _bn_mm_pool_call(y_prev, scale, shift, w, tr, ns, tg):
    R, cin = y_prev.shape
    cout = w.shape[1]
    n_tiles = R // tr
    return pl.pallas_call(
        functools.partial(_bn_mm_pool_kernel, nsample=ns),
        grid=(n_tiles,),
        in_specs=[pl.BlockSpec((tr, cin), lambda i: (i, 0)),
                  pl.BlockSpec((1, cin), lambda i: (0, 0)),
                  pl.BlockSpec((1, cin), lambda i: (0, 0)),
                  pl.BlockSpec((cin, cout), lambda i: (0, 0))],
        out_specs=(pl.BlockSpec((1, 2, cout), lambda i: (i, 0, 0)),
                   pl.BlockSpec((1, tg, cout), lambda i: (i, 0, 0)),
                   pl.BlockSpec((1, tg, cout), lambda i: (i, 0, 0))),
        out_shape=(jax.ShapeDtypeStruct((n_tiles, 2, cout), jnp.float32),
                   jax.ShapeDtypeStruct((n_tiles, tg, cout), jnp.float32),
                   jax.ShapeDtypeStruct((n_tiles, tg, cout), jnp.float32)),
        compiler_params=_MOSAIC_PARAMS,
    )(y_prev, scale, shift, w)


def _bn_fold(stats, gamma, beta, n_rows):
    """Reduce per-tile partial stats -> per-channel BN scale/shift (training
    batch statistics, biased variance — matches nn.BatchNorm2d in train mode).
    NOTE: E[x^2]-E[x]^2 in f32; fine at these magnitudes (padded channels have
    gamma=0 so their degenerate stats are harmless)."""
    total = jnp.sum(stats, axis=0)                    # (2, C)
    mean = total[0] / n_rows                          # (C,)
    var = jnp.maximum(total[1] / n_rows - mean * mean, 0.0)
    scale = gamma * jax.lax.rsqrt(var + _BN_EPS)[None, :]   # (1, C)
    shift = beta - mean[None, :] * scale                    # (1, C)
    return scale, shift


def run_sa_mlp(new_points, layer_params, mlp_widths):
    """new_points: [B, S, ns, Cin].
    layer_params: list of (w bf16 [Cin(_pad), Cout_pad], gamma f32, beta f32).
    Returns pooled features [B, S, C_last] (unpadded, f32)."""
    B, S, ns, cin = new_points.shape
    n_groups = B * S
    R = n_groups * ns
    n_layers = len(layer_params)
    assert n_layers >= 2, "SA MLP with a single layer is not supported here"
    # TODO(synk): a 1-layer MLP would need a matmul+pool kernel without the
    # fused BN prologue; GhostMLPModel never uses one.

    x = new_points.reshape(R, cin).astype(jnp.bfloat16)   # true Cin, no lane pad

    dims = [w.shape for (w, _, _) in layer_params]         # (cin_i, cout_i)
    tg = _pick_group_tile(n_groups, ns, dims)
    tr = tg * ns

    # Layer 0: matmul + partial stats.
    y, stats = _mm_stats_call(x, layer_params[0][0], tr)
    # Layers 1..L-2: fused BN_{i-1}+ReLU with matmul_i (+ partial stats of i).
    for i in range(1, n_layers - 1):
        _, gamma, beta = layer_params[i - 1]
        scale, shift = _bn_fold(stats, gamma, beta, R)
        y, stats = _bn_mm_stats_call(y, scale, shift, layer_params[i][0], tr)
    # Last layer: fused BN_{L-2}+ReLU, matmul, per-group raw max/min (+ stats).
    _, gamma_p, beta_p = layer_params[n_layers - 2]
    scale, shift = _bn_fold(stats, gamma_p, beta_p, R)
    stats, gmax, gmin = _bn_mm_pool_call(
        y, scale, shift, layer_params[-1][0], tr, ns, tg)

    # Tiny epilogue: BN_{L-1}+ReLU+max recovered from raw per-group max/min.
    _, gamma, beta = layer_params[-1]
    scale_l, shift_l = _bn_fold(stats, gamma, beta, R)
    cpad = layer_params[-1][0].shape[1]
    omax = gmax.reshape(n_groups, cpad)
    omin = gmin.reshape(n_groups, cpad)
    pooled = jnp.maximum(
        jnp.where(scale_l >= 0.0, scale_l * omax, scale_l * omin) + shift_l, 0.0)

    c_out = mlp_widths[-1]
    return pooled[:, :c_out].reshape(B, S, c_out)


# -----------------------------------------------------------------------------
# Module wrapper (PointNetSetAbstraction forward).
# -----------------------------------------------------------------------------
class PointNetSetAbstractionPallas:
    def __init__(self, npoint, radius, nsample, in_channel, mlp, group_all, key):
        self.npoint = npoint
        self.radius = radius
        self.nsample = nsample
        self.group_all = group_all
        self.mlp = list(mlp)

        # Deterministic synthetic Conv2d(1x1) weights + BN affine.  Weights are
        # pre-cast to bf16 and zero-padded to 128-lane output widths (layer-0
        # input keeps its true Cin).  The conv bias is dropped: a per-channel
        # constant added before batch-stat BatchNorm is cancelled exactly.
        self.layer_params = []
        last, last_dim = in_channel, in_channel
        for out in mlp:
            out_pad = _round_up(out, LANE)
            key, kw = jax.random.split(key)
            w = (jax.random.normal(kw, (last, out), jnp.float32)
                 / jnp.sqrt(jnp.float32(last)))
            gamma = 1.0 + 0.05 * jnp.arange(out, dtype=jnp.float32)
            beta = 0.01 * jnp.arange(out, dtype=jnp.float32)
            w_pad = (jnp.zeros((last_dim, out_pad), jnp.bfloat16)
                     .at[:last, :out].set(w.astype(jnp.bfloat16)))
            gamma_pad = jnp.zeros((1, out_pad), jnp.float32).at[0, :out].set(gamma)
            beta_pad = jnp.zeros((1, out_pad), jnp.float32).at[0, :out].set(beta)
            self.layer_params.append((w_pad, gamma_pad, beta_pad))
            last, last_dim = out, out_pad

    def forward(self, xyz, points):
        """xyz: [B,3,N], points: [B,D,N] -> (new_xyz [B,3,S], feats [B,C_last,S])."""
        xyz_t = jnp.transpose(xyz, (0, 2, 1))
        points_t = None if points is None else jnp.transpose(points, (0, 2, 1))

        if self.group_all:
            new_xyz, new_points = sample_and_group_all(xyz_t, points_t)
        else:
            new_xyz, new_points = sample_and_group(
                self.npoint, self.radius, self.nsample, xyz_t, points_t)

        pooled = run_sa_mlp(new_points.astype(jnp.float32),
                            self.layer_params, self.mlp)        # [B,S,C_out]

        new_xyz_out = jnp.transpose(new_xyz, (0, 2, 1))          # [B,3,S]
        feats_out = jnp.transpose(pooled, (0, 2, 1))             # [B,C_out,S]
        return new_xyz_out, feats_out


# -----------------------------------------------------------------------------
# Demo.
# -----------------------------------------------------------------------------
if __name__ == "__main__":
    key = jax.random.PRNGKey(0)
    kx, kp, kw1, kw2 = jax.random.split(key, 4)

    # Small-but-tiled config: 64 groups x 16 samples -> 1024 rows, 3-layer MLP
    # (exercises layer-0, middle, and fused-pool kernels), 2 row tiles on a
    # "parallel" grid.
    B, N, D = 2, 128, 4
    npoint, radius, nsample = 32, 0.4, 16
    mlp = [32, 32, 64]
    in_channel = 3 + D

    xyz = jax.random.uniform(kx, (B, 3, N), jnp.float32)
    points = jax.random.normal(kp, (B, D, N), jnp.float32)

    sa = PointNetSetAbstractionPallas(
        npoint=npoint, radius=radius, nsample=nsample,
        in_channel=in_channel, mlp=mlp, group_all=False, key=kw1)
    new_xyz, feats = sa.forward(xyz, points)
    jax.block_until_ready((new_xyz, feats))
    assert new_xyz.shape == (B, 3, npoint), new_xyz.shape
    assert feats.shape == (B, mlp[-1], npoint), feats.shape
    assert jnp.all(jnp.isfinite(new_xyz)) and jnp.all(jnp.isfinite(feats))

    # group_all path (mirrors GhostMLPModel.sa3 at reduced width): 2 groups x
    # 128 samples -> 2 grid tiles even in this path.
    sa_all = PointNetSetAbstractionPallas(
        npoint=None, radius=None, nsample=None,
        in_channel=3 + D, mlp=[64, 128], group_all=True, key=kw2)
    g_xyz, g_feats = sa_all.forward(xyz, points)
    jax.block_until_ready((g_xyz, g_feats))
    assert g_xyz.shape == (B, 3, 1), g_xyz.shape
    assert g_feats.shape == (B, 128, 1), g_feats.shape
    assert jnp.all(jnp.isfinite(g_feats))

    print("KERNEL_OK")
</pallas_src>

<mosaic_0001>
module attributes {stable_mosaic.version = 11 : i64} {
  func.func @_mm_stats_kernel(%arg0: i32, %arg1: memref<512x7xbf16, #tpu.memory_space<vmem>>, %arg2: memref<7x128xbf16, #tpu.memory_space<vmem>>, %arg3: memref<512x128xbf16, #tpu.memory_space<vmem>>, %arg4: memref<1x2x128xf32, #tpu.memory_space<vmem>>) attributes {dimension_semantics = [#tpu.dimension_semantics<parallel>], iteration_bounds = array<i64: 2>, scalar_prefetch = 0 : i64, scratch_operands = 0 : i64, tpu.core_type = #tpu.core_type<tc>, window_params = [{transform_indices = @transform_0, window_bounds = array<i64: 512, 7>}, {pipeline_mode = #tpu.pipeline_mode<synchronous>, transform_indices = @transform_1, window_bounds = array<i64: 7, 128>}, {transform_indices = @transform_2, window_bounds = array<i64: 512, 128>}, {transform_indices = @transform_3, window_bounds = array<i64: 1, 2, 128>}]} {
    %c0 = arith.constant 0 : index
    %c0_0 = arith.constant 0 : index
    %0 = vector.load %arg1[%c0, %c0_0] : memref<512x7xbf16, #tpu.memory_space<vmem>>, vector<512x7xbf16>
    %c0_1 = arith.constant 0 : index
    %c0_2 = arith.constant 0 : index
    %1 = vector.load %arg2[%c0_1, %c0_2] : memref<7x128xbf16, #tpu.memory_space<vmem>>, vector<7x128xbf16>
    %cst = arith.constant dense<0.000000e+00> : vector<512x128xf32>
    %2 = tpu.matmul %0, %1, %cst {dimension_numbers = #tpu.dot_dimension_numbers<[1], [0], [0], [1], [0, 0, 1, 1], [], []>} : vector<512x7xbf16>, vector<7x128xbf16>, vector<512x128xf32> -> vector<512x128xf32>
    %3 = arith.truncf %2 : vector<512x128xf32> to vector<512x128xbf16>
    %c0_3 = arith.constant 0 : index
    %c0_4 = arith.constant 0 : index
    %4 = vector.load %arg3[%c0_3, %c0_4] : memref<512x128xbf16, #tpu.memory_space<vmem>>, vector<512x128xbf16>
    tpu.vector_store %arg3[%c0_3, %c0_4], %3 {strides = array<i32>} : memref<512x128xbf16, #tpu.memory_space<vmem>>, vector<512x128xbf16>,
    %cst_5 = arith.constant dense<0.000000e+00> : vector<128xf32>
    %5 = vector.multi_reduction <add>, %2, %cst_5 [0] : vector<512x128xf32> to vector<128xf32>
    %6 = vector.shape_cast %5 : vector<128xf32> to vector<1x128xf32>
    %7 = arith.mulf %2, %2 : vector<512x128xf32>
    %cst_6 = arith.constant dense<0.000000e+00> : vector<128xf32>
    %8 = vector.multi_reduction <add>, %7, %cst_6 [0] : vector<512x128xf32> to vector<128xf32>
    %9 = vector.shape_cast %8 : vector<128xf32> to vector<1x128xf32>
    %10 = tpu.concatenate %6, %9 in 0 : vector<1x128xf32>, vector<1x128xf32> -> vector<2x128xf32>
    %11 = vector.shape_cast %10 : vector<2x128xf32> to vector<1x2x128xf32>
    %c0_7 = arith.constant 0 : index
    %c0_8 = arith.constant 0 : index
    %c0_9 = arith.constant 0 : index
    %12 = vector.load %arg4[%c0_7, %c0_8, %c0_9] : memref<1x2x128xf32, #tpu.memory_space<vmem>>, vector<1x2x128xf32>
    tpu.vector_store %arg4[%c0_7, %c0_8, %c0_9], %11 {strides = array<i32>} : memref<1x2x128xf32, #tpu.memory_space<vmem>>, vector<1x2x128xf32>,
    return
  }
  func.func @transform_0(%arg0: i32) -> (i32, i32) {
    %c0_i32 = arith.constant 0 : i32
    %c0_i32_0 = arith.constant 0 : i32
    return %arg0, %c0_i32 : i32, i32
  }
  func.func @transform_1(%arg0: i32) -> (i32, i32) {
    %c0_i32 = arith.constant 0 : i32
    %c0_i32_0 = arith.constant 0 : i32
    %c0_i32_1 = arith.constant 0 : i32
    return %c0_i32, %c0_i32_0 : i32, i32
  }
  func.func @transform_2(%arg0: i32) -> (i32, i32) {
    %c0_i32 = arith.constant 0 : i32
    %c0_i32_0 = arith.constant 0 : i32
    return %arg0, %c0_i32 : i32, i32
  }
  func.func @transform_3(%arg0: i32) -> (i32, i32, i32) {
    %c0_i32 = arith.constant 0 : i32
    %c0_i32_0 = arith.constant 0 : i32
    %c0_i32_1 = arith.constant 0 : i32
    return %arg0, %c0_i32, %c0_i32_0 : i32, i32, i32
  }
}

</mosaic_0001>

<bundles_post_ra>
// kernel: tpu_custom_call.1
= control target key start
LH: loop header
LB: loop body
LE: loop exit
PB: predicated region body
PF: predicated region fallthrough
CT: control target
= control target key end

     0   :  { %9 = vsyncpa [#allocation3], 0  ;;  %s2585_s0 = inlined_call_operand.vmem [shape: bf16[1024,7], index: 0, kind: input, shape index: {}]   ;;  %s2586_s1 = inlined_call_operand.vmem [shape: bf16[7,128], index: 1, kind: input, shape index: {}]   ;;  %s2587_s2 = inlined_call_operand.hbm [shape: bf16[1024,128], index: 2, kind: output, shape index: {0}]   ;;  %s2588_s3 = inlined_call_operand.hbm [shape: f32[2,2,128], index: 3, kind: output, shape index: {1}]  }
   0x1   :  { %11 = vsyncpa [#allocation3 + $0x1], 0 }
   0x2   :  { %12 = vsyncpa [#allocation5], 0 }
   0x3   :  { %14 = vsyncpa [#allocation5 + $0x1], 0  ;;  %s2153_s12 = smov 0   ;;  %s2155_s13 = smov 0  }
   0x4   :  { %s2157_s14 = smov 0   ;;  %s2159_s15 = smov 0  }
   0x5 LB: > { %s2174_s16 = sadd.s32 4294967295, %s2126_s15   ;;  %s1453_s17 = sadd.s32 4294967294, %s2126_s15   ;;  %s2126_s15 = sphi %s2159_s15, %s2594_s15   ;;  %s2122_s14 = sphi %s2157_s14, %s2593_s14   ;;  %s2118_s13 = sphi %s2155_s13, %s2592_s13   ;;  %s2114_s12 = sphi %s2153_s12, %s2591_s12  }
   0x6   : > { %s2178_s18 = sadd.s32 1, %s2126_s15   ;;  %s74_s19 = sadd.s32 1, %s2122_s14 }
   0x7   : > { %s71_s20 = ssub.s32 %s2126_s15, %s2178_s18  ;;  %p84_p0 = scmp.ne.s32.totalorder %s2122_s14, %s2118_s13 }
   0x8   : > { %p72_p1 = scmp.eq.s32.totalorder %s71_s20, 0  ;;  %p85_p2 = scmp.eq.s32.totalorder %s2174_s16, 1 }
   0x9   : > { %p90_p3 = scmp.ne.s32.totalorder %s2118_s13, %s2114_s12  ;;  %p91_p4 = scmp.eq.s32.totalorder %s1453_s17, 1 }
   0xa   : > { %s2189_s21 = scalar_select %p72_p1, %s2122_s14, %s74_s19  }
   0xb   : > { %p2191_p5 = por %p85_p2, %p84_p0  ;;  %p2195_p6 = por %p91_p4, %p90_p3 }
   0xc   : > { %p1456_p7 = scmp.ge.s32.totalorder %s2126_s15, 1  ;;  %p147_p8 = scmp.lt.s32.totalorder %s2126_s15, 3 }
   0xe   : > { %p148_p9 = pnand %p1456_p7, %p147_p8 }
   0xf   : > { %v248_v0 = vld [vmem:[%s2586_s1] sm:$0xf] (!%p148_p9)  ;;  %vm506_vm0 = vcmask (!%p148_p9), 1042432   ;;  %vm507_vm1 = vcmask (!%p148_p9), 1043456   ;;  %s1459_s26 = sshll.u32 (!%p148_p9), %s2174_s16, 6  ;;  %v2128_v1 = vmov (!%p148_p9), 65535  }
  0x10   : > { %151 = sbr.rel (%p148_p9) target bundleno = 409 (0x199), region = 28  ;;  %v508_v2 = vsel (!%p148_p9), %vm506_vm0, 4294967295, %v2128_v1  ;;  %p177_p10 = scmp.lt.s32.totalorder (!%p148_p9), %s1459_s26, 127  ;;  %vm409_vm2 = vcmask (!%p148_p9), 56320  }
  0x11   : > { %v509_v3 = vsel (!%p148_p9), %vm507_vm1, %v508_v2, 0  ;;  %s2275_s4 = sand.u32 (!%p148_p9), 1, %s2118_s13   ;;  %s1660_s7 = sshll.u32 (!%p148_p9), %s2174_s16, 12 }
  0x12   : > { %v511_v4 = vand.u32 (!%p148_p9), %v509_v3, %v248_v0  ;;  %s1457_s5 = sshll.u32 (!%p148_p9), %s2275_s4, 8  ;;  %s2424_s11 = scalar_lea.hbm (!%p148_p9), %s2587_s2, %s1660_s7 }
  0x13   : > { %s2278_s6 = scalar_lea.vmem (!%p148_p9), [#allocation2], %s1457_s5  ;;  %s1328_s17 = scalar_lea.sflag (!%p148_p9), [#allocation3], %s2275_s4 }
  0x14   : > { %1885 = vmatprep.subr.bf16.mxu0 (!%p148_p9), %v511_v4  ;;  %1951 = vmatprep.subr.bf16.mxu1 (!%p148_p9), %v511_v4  ;;  %s1346_s8 = sshll.u32 (!%p148_p9), %s2278_s6, 4  ;;  %s2129_s20 = smov (!%p148_p9), [#allocation2]   ;;  %s2426_s8 = int_to_ptr.vmem [resolvable:$true] %s1346_s8 }
  0x15   : > { %1886 = vmatpush3.bf16.msra.mxu0 (!%p148_p9), %v511_v4  ;;  %1952 = vmatpush3.bf16.msra.mxu1 (!%p148_p9), %v511_v4  ;;  %s2032_s19 = scalar_lea.vmem (!%p148_p9), %s2426_s8, 4096  ;;  %s2036_s24 = sshll.u32 (!%p148_p9), %s2129_s20, 4  ;;  %s2037_s24 = int_to_ptr.vmem [resolvable:$false] %s2036_s24 }
  0x16   : > { %p2033_p11 = scmp.ne.s32.totalorder (!%p148_p9), %s2426_s8, %s2032_s19  ;;  %s2038_s25 = scalar_lea.vmem (!%p148_p9), %s2037_s24, 8192 }
  0x17   : > { %s2596_s26 = smov (!%p177_p10, %s1459_s26), 127  ;;  %p2039_p0 = scmp.lt.s32.totalorder %s2426_s8, %s2037_s24 }
  0x18   : > { %s1460_s27 = sshll.u32 %s2596_s26, 2  ;;  %p2034_p12 = pnand %p2033_p11, %p2191_p5 }
  0x19   : > { %s2208_s30 = scalar_lea.vmem %s2585_s0, %s1460_s27  ;;  %p2040_p1 = scmp.lt.s32.totalorder %s2038_s25, %s2032_s19 }
  0x1a   : > { %v2000_v5 = vld [vmem:[%s2208_s30] sm:$0xff]   ;;  %v2001_v6 = vld [vmem:[%s2208_s30 + $0x8] sm:$0xff]   ;;  %v2002_v7 = vld [vmem:[%s2208_s30 + $0x10] sm:$0xff]   ;;  %p2035_p13 = pneg %p2034_p12 }
  0x1b   : > { %1887 = vmatprep.mubr.msk.bf16.mxu0 %vm409_vm2, %v2000_v5  ;;  %v2003_v8 = vld [vmem:[%s2208_s30 + $0x18] sm:$0xff]   ;;  %v2004_v9 = vld [vmem:[%s2208_s30 + $0x20] sm:$0xff]   ;;  %v2005_v10 = vld [vmem:[%s2208_s30 + $0x28] sm:$0xff]   ;;  %p2041_p2 = por %p2040_p1, %p2039_p0 }
  0x1c   : > { %1888 = vmatmul.mubr.msk.bf16.vlgmr.msra.gmra.mrb[0].mxu0 %vm409_vm2, %v2001_v6  ;;  %v2006_v11 = vld [vmem:[%s2208_s30 + $0x30] sm:$0xff]   ;;  %v2016_v12 = vld [vmem:[%s2208_s30 + $0x80] sm:$0xff]   ;;  %v2017_v13 = vld [vmem:[%s2208_s30 + $0x88] sm:$0xff]  }
  0x1d   : > { %1891 = vmatprep.mubr.msk.bf16.mxu0 %vm409_vm2, %v2002_v7  ;;  %1919 = vmatprep.mubr.msk.bf16.mxu1 %vm409_vm2, %v2016_v12  ;;  %v2018_v14 = vld [vmem:[%s2208_s30 + $0x90] sm:$0xff]   ;;  %v2007_v15 = vld [vmem:[%s2208_s30 + $0x38] sm:$0xff]   ;;  %v2008_v16 = vld [vmem:[%s2208_s30 + $0x40] sm:$0xff]   ;;  %p2042_p3 = pnand %p2041_p2, %p2035_p13 }
  0x1e   : > { %1920 = vmatmul.mubr.msk.bf16.vlgmr.msra.gmra.mrb[0].mxu1 %vm409_vm2, %v2017_v13  ;;  %v2019_v17 = vld [vmem:[%s2208_s30 + $0x98] sm:$0xff]   ;;  %v2020_v18 = vld [vmem:[%s2208_s30 + $0xa0] sm:$0xff]   ;;  %v2009_v19 = vld [vmem:[%s2208_s30 + $0x48] sm:$0xff]  }
  0x1f   : > { %1923 = vmatprep.mubr.msk.bf16.mxu1 %vm409_vm2, %v2018_v14  ;;  %v2021_v20 = vld [vmem:[%s2208_s30 + $0xa8] sm:$0xff]   ;;  %v2010_v21 = vld [vmem:[%s2208_s30 + $0x50] sm:$0xff]   ;;  %v2011_v23 = vld [vmem:[%s2208_s30 + $0x58] sm:$0xff]  }
  0x20   : > { %v2022_v22 = vld [vmem:[%s2208_s30 + $0xb0] sm:$0xff]   ;;  %v2023_v24 = vld [vmem:[%s2208_s30 + $0xb8] sm:$0xff]   ;;  %v2012_v25 = vld [vmem:[%s2208_s30 + $0x60] sm:$0xff]  }
  0x21   : > { %v2024_v26 = vld [vmem:[%s2208_s30 + $0xc0] sm:$0xff]   ;;  %v2013_v27 = vld [vmem:[%s2208_s30 + $0x68] sm:$0xff]   ;;  %v2014_v29 = vld [vmem:[%s2208_s30 + $0x70] sm:$0xff]  }
  0x22   : > { %v2025_v28 = vld [vmem:[%s2208_s30 + $0xc8] sm:$0xff]   ;;  %v2026_v30 = vld [vmem:[%s2208_s30 + $0xd0] sm:$0xff]   ;;  %v2015_v31 = vld [vmem:[%s2208_s30 + $0x78] sm:$0xff]  }
  0x23   : > { %v2027_v32 = vld [vmem:[%s2208_s30 + $0xd8] sm:$0xff]   ;;  %v2028_v33 = vld [vmem:[%s2208_s30 + $0xe0] sm:$0xff]   ;;  %v2029_v34 = vld [vmem:[%s2208_s30 + $0xe8] sm:$0xff]  }
  0x24   : > { %1892 = vmatmul.mubr.msk.bf16.gmra.mrb[4].mxu0 %vm409_vm2, %v2003_v8  ;;  %v2030_v35 = vld [vmem:[%s2208_s30 + $0xf0] sm:$0xff]   ;;  %v2031_v36 = vld [vmem:[%s2208_s30 + $0xf8] sm:$0xff]  }
  0x25   : > { %1895 = vmatprep.mubr.msk.bf16.mxu0 %vm409_vm2, %v2004_v9 }
  0x26   : > { %1924 = vmatmul.mubr.msk.bf16.gmra.mrb[4].mxu1 %vm409_vm2, %v2019_v17 }
  0x27   : > { %1927 = vmatprep.mubr.msk.bf16.mxu1 %vm409_vm2, %v2020_v18 }
  0x2c   : > { %1896 = vmatmul.mubr.msk.bf16.gmra.mrb[8].mxu0 %vm409_vm2, %v2005_v10 }
  0x2d   : > { %1899 = vmatprep.mubr.msk.bf16.mxu0 %vm409_vm2, %v2006_v11 }
  0x2e   : > { %1928 = vmatmul.mubr.msk.bf16.gmra.mrb[8].mxu1 %vm409_vm2, %v2021_v20 }
  0x2f   : > { %1931 = vmatprep.mubr.msk.bf16.mxu1 %vm409_vm2, %v2022_v22 }
  0x34   : > { %1900 = vmatmul.mubr.msk.bf16.gmra.mrb[12].mxu0 %vm409_vm2, %v2007_v15 }
  0x35   : > { %1903 = vmatprep.mubr.msk.bf16.mxu0 %vm409_vm2, %v2008_v16 }
  0x36   : > { %1932 = vmatmul.mubr.msk.bf16.gmra.mrb[12].mxu1 %vm409_vm2, %v2023_v24 }
  0x37   : > { %1935 = vmatprep.mubr.msk.bf16.mxu1 %vm409_vm2, %v2024_v26 }
  0x3c   : > { %1904 = vmatmul.mubr.msk.bf16.gmra.mrb[16].mxu0 %vm409_vm2, %v2009_v19 }
  0x3d   : > { %1907 = vmatprep.mubr.msk.bf16.mxu0 %vm409_vm2, %v2010_v21 }
  0x3e   : > { %1936 = vmatmul.mubr.msk.bf16.gmra.mrb[16].mxu1 %vm409_vm2, %v2025_v28 }
  0x3f   : > { %1939 = vmatprep.mubr.msk.bf16.mxu1 %vm409_vm2, %v2026_v30 }
  0x44   : > { %1908 = vmatmul.mubr.msk.bf16.gmra.mrb[20].mxu0 %vm409_vm2, %v2011_v23 }
  0x45   : > { %1911 = vmatprep.mubr.msk.bf16.mxu0 %vm409_vm2, %v2012_v25 }
  0x46   : > { %1940 = vmatmul.mubr.msk.bf16.gmra.mrb[20].mxu1 %vm409_vm2, %v2027_v32 }
  0x47   : > { %1943 = vmatprep.mubr.msk.bf16.mxu1 %vm409_vm2, %v2028_v33 }
  0x4c   : > { %1912 = vmatmul.mubr.msk.bf16.gmra.mrb[24].mxu0 %vm409_vm2, %v2013_v27 }
  0x4d   : > { %1915 = vmatprep.mubr.msk.bf16.mxu0 %vm409_vm2, %v2014_v29 }
  0x4e   : > { %1944 = vmatmul.mubr.msk.bf16.gmra.mrb[24].mxu1 %vm409_vm2, %v2029_v34 }
  0x4f   : > { %1947 = vmatprep.mubr.msk.bf16.mxu1 %vm409_vm2, %v2030_v35 }
  0x54   : > { %1916 = vmatmul.mubr.msk.bf16.gmra.mrb[28].mxu0 %vm409_vm2, %v2015_v31 }
  0x56   : > { %1948 = vmatmul.mubr.msk.bf16.gmra.mrb[28].mxu1 %vm409_vm2, %v2031_v36 }
  0xef   : > { %v1889_v37 = vpop.f32.mrb[0].mxu0 }
  0xf0   : > { %v547_v38 = vpop.f32.mrb[1].mxu0  ;;  %v1193_v46 = vmul.f32 %v1889_v37, %v1889_v37 }
  0xf1   : > { %v1890_v39 = vpop.f32.mrb[2].mxu0  ;;  %v1191_v42 = vmul.f32 %v547_v38, %v547_v38  ;;  %v2284_v7 = vpop.f32.mrb[0].mxu1 }
  0xf2   : > { %v1669_v40 = vpack.c.bf16 %v1890_v39, %v1889_v37  ;;  %v550_v41 = vpop.f32.mrb[3].mxu0  ;;  %v1194_v49 = vmul.f32 %v1890_v39, %v1890_v39  ;;  %v2286_v9 = vpop.f32.mrb[1].mxu1 }
  0xf3   : > { %v1664_v43 = vpack.c.bf16 %v550_v41, %v547_v38  ;;  %v1122_v44 = vadd.f32 %v550_v41, %v547_v38  ;;  %v1192_v45 = vmul.f32 %v550_v41, %v550_v41  ;;  %v2288_v14 = vpop.f32.mrb[2].mxu1 }
  0xf4   : > { %1821 = vst [vmem:[%s2278_s6 + $0x8] sm:$0xff] %v1669_v40   ;;  %v1749_v17 = vpack.c.bf16 %v2288_v14, %v2284_v7  ;;  %v2292_v18 = vpop.f32.mrb[3].mxu1 }
  0xf5   : > { %1665 = vst [vmem:[%s2278_s6] sm:$0xff] %v1664_v43   ;;  %v1123_v47 = vadd.f32 %v1889_v37, %v1122_v44  ;;  %v1255_v48 = vadd.f32 %v1192_v45, %v1191_v42  ;;  %v1744_v23 = vpack.c.bf16 %v2292_v18, %v2286_v9 }
  0xf6   : > { %1837 = vst [vmem:[%s2278_s6 + $0x88] sm:$0xff] %v1749_v17  }
  0xf7   : > { %v1256_v50 = vadd.f32 %v1255_v48, %v1193_v46  ;;  %v1893_v51 = vpop.f32.mrb[4].mxu0  ;;  %v1124_v52 = vadd.f32 %v1890_v39, %v1123_v47  ;;  %1836 = vst [vmem:[%s2278_s6 + $0x80] sm:$0xff] %v1744_v23  }
  0xf8   : > { %v563_v53 = vpop.f32.mrb[5].mxu0  ;;  %v1197_v0 = vmul.f32 %v1893_v51, %v1893_v51 }
  0xf9   : > { %v1125_v54 = vadd.f32 %v1124_v52, %v563_v53  ;;  %v1195_v55 = vmul.f32 %v563_v53, %v563_v53  ;;  %v1257_v56 = vadd.f32 %v1256_v50, %v1194_v49  ;;  %v1894_v57 = vpop.f32.mrb[6].mxu0  ;;  %v2300_v31 = vpop.f32.mrb[4].mxu1 }
  0xfa   : > { %v1679_v58 = vpack.c.bf16 %v1894_v57, %v1893_v51  ;;  %v566_v59 = vpop.f32.mrb[7].mxu0  ;;  %v1198_v3 = vmul.f32 %v1894_v57, %v1894_v57  ;;  %v2302_v33 = vpop.f32.mrb[5].mxu1 }
  0xfb   : > { %v1258_v60 = vadd.f32 %v1257_v56, %v1195_v55  ;;  %v1674_v61 = vpack.c.bf16 %v566_v59, %v563_v53  ;;  %v1126_v62 = vadd.f32 %v1125_v54, %v566_v59  ;;  %v1196_v63 = vmul.f32 %v566_v59, %v566_v59  ;;  %v2304_v38 = vpop.f32.mrb[6].mxu1 }
  0xfc   : > { %1823 = vst [vmem:[%s2278_s6 + $0x18] sm:$0xff] %v1679_v58   ;;  %v1759_v41 = vpack.c.bf16 %v2304_v38, %v2300_v31  ;;  %v2308_v42 = vpop.f32.mrb[7].mxu1 }
  0xfd   : > { %1822 = vst [vmem:[%s2278_s6 + $0x10] sm:$0xff] %v1674_v61   ;;  %v1127_v1 = vadd.f32 %v1893_v51, %v1126_v62  ;;  %v1259_v2 = vadd.f32 %v1258_v60, %v1196_v63  ;;  %v1754_v47 = vpack.c.bf16 %v2308_v42, %v2302_v33 }
  0xfe   : > { %1839 = vst [vmem:[%s2278_s6 + $0x98] sm:$0xff] %v1759_v41  }
  0xff   : > { %v1260_v4 = vadd.f32 %v1259_v2, %v1197_v0  ;;  %v1897_v5 = vpop.f32.mrb[8].mxu0  ;;  %v1128_v6 = vadd.f32 %v1894_v57, %v1127_v1  ;;  %1838 = vst [vmem:[%s2278_s6 + $0x90] sm:$0xff] %v1754_v47  }
 0x100   : > { %v579_v8 = vpop.f32.mrb[9].mxu0  ;;  %v1201_v24 = vmul.f32 %v1897_v5, %v1897_v5 }
 0x101   : > { %v1129_v10 = vadd.f32 %v1128_v6, %v579_v8  ;;  %v1199_v11 = vmul.f32 %v579_v8, %v579_v8  ;;  %v1261_v12 = vadd.f32 %v1260_v4, %v1198_v3  ;;  %v1898_v13 = vpop.f32.mrb[10].mxu0  ;;  %v2316_v55 = vpop.f32.mrb[8].mxu1 }
 0x102   : > { %v1689_v15 = vpack.c.bf16 %v1898_v13, %v1897_v5  ;;  %v582_v16 = vpop.f32.mrb[11].mxu0  ;;  %v1202_v27 = vmul.f32 %v1898_v13, %v1898_v13  ;;  %v2318_v57 = vpop.f32.mrb[9].mxu1 }
 0x103   : > { %v1262_v19 = vadd.f32 %v1261_v12, %v1199_v11  ;;  %v1684_v20 = vpack.c.bf16 %v582_v16, %v579_v8  ;;  %v1130_v21 = vadd.f32 %v1129_v10, %v582_v16  ;;  %v1200_v22 = vmul.f32 %v582_v16, %v582_v16  ;;  %v2320_v62 = vpop.f32.mrb[10].mxu1 }
 0x104   : > { %1825 = vst [vmem:[%s2278_s6 + $0x28] sm:$0xff] %v1689_v15   ;;  %v1769_v1 = vpack.c.bf16 %v2320_v62, %v2316_v55  ;;  %v2324_v2 = vpop.f32.mrb[11].mxu1 }
 0x105   : > { %1824 = vst [vmem:[%s2278_s6 + $0x20] sm:$0xff] %v1684_v20   ;;  %v1131_v25 = vadd.f32 %v1897_v5, %v1130_v21  ;;  %v1263_v26 = vadd.f32 %v1262_v19, %v1200_v22  ;;  %v1764_v8 = vpack.c.bf16 %v2324_v2, %v2318_v57 }
 0x106   : > { %1841 = vst [vmem:[%s2278_s6 + $0xa8] sm:$0xff] %v1769_v1  }
 0x107   : > { %v1264_v28 = vadd.f32 %v1263_v26, %v1201_v24  ;;  %v1901_v29 = vpop.f32.mrb[12].mxu0  ;;  %v1132_v30 = vadd.f32 %v1898_v13, %v1131_v25  ;;  %1840 = vst [vmem:[%s2278_s6 + $0xa0] sm:$0xff] %v1764_v8  }
 0x108   : > { %v595_v32 = vpop.f32.mrb[13].mxu0  ;;  %v1205_v48 = vmul.f32 %v1901_v29, %v1901_v29 }
 0x109   : > { %v1133_v34 = vadd.f32 %v1132_v30, %v595_v32  ;;  %v1203_v35 = vmul.f32 %v595_v32, %v595_v32  ;;  %v1265_v36 = vadd.f32 %v1264_v28, %v1202_v27  ;;  %v1902_v37 = vpop.f32.mrb[14].mxu0  ;;  %v2332_v19 = vpop.f32.mrb[12].mxu1 }
 0x10a   : > { %v1699_v39 = vpack.c.bf16 %v1902_v37, %v1901_v29  ;;  %v598_v40 = vpop.f32.mrb[15].mxu0  ;;  %v1206_v51 = vmul.f32 %v1902_v37, %v1902_v37  ;;  %v2334_v21 = vpop.f32.mrb[13].mxu1 }
 0x10b   : > { %v1266_v43 = vadd.f32 %v1265_v36, %v1203_v35  ;;  %v1694_v44 = vpack.c.bf16 %v598_v40, %v595_v32  ;;  %v1134_v45 = vadd.f32 %v1133_v34, %v598_v40  ;;  %v1204_v46 = vmul.f32 %v598_v40, %v598_v40  ;;  %v2336_v26 = vpop.f32.mrb[14].mxu1 }
 0x10c   : > { %1827 = vst [vmem:[%s2278_s6 + $0x38] sm:$0xff] %v1699_v39   ;;  %v2340_v30 = vpop.f32.mrb[15].mxu1 }
 0x10d   : > { %1826 = vst [vmem:[%s2278_s6 + $0x30] sm:$0xff] %v1694_v44   ;;  %v1135_v49 = vadd.f32 %v1901_v29, %v1134_v45  ;;  %v1267_v50 = vadd.f32 %v1266_v43, %v1204_v46  ;;  %v1779_v29 = vpack.c.bf16 %v2336_v26, %v2332_v19 }
 0x10f   : > { %v1268_v52 = vadd.f32 %v1267_v50, %v1205_v48  ;;  %v1905_v53 = vpop.f32.mrb[16].mxu0  ;;  %v1136_v54 = vadd.f32 %v1902_v37, %v1135_v49  ;;  %1843 = vst [vmem:[%s2278_s6 + $0xb8] sm:$0xff] %v1779_v29   ;;  %v1774_v37 = vpack.c.bf16 %v2340_v30, %v2334_v21 }
 0x110   : > { %v611_v56 = vpop.f32.mrb[17].mxu0  ;;  %v1209_v10 = vmul.f32 %v1905_v53, %v1905_v53 }
 0x111   : > { %v1137_v58 = vadd.f32 %v1136_v54, %v611_v56  ;;  %v1207_v59 = vmul.f32 %v611_v56, %v611_v56  ;;  %v1269_v60 = vadd.f32 %v1268_v52, %v1206_v51  ;;  %v1906_v61 = vpop.f32.mrb[18].mxu0  ;;  %1842 = vst [vmem:[%s2278_s6 + $0xb0] sm:$0xff] %v1774_v37   ;;  %v2348_v47 = vpop.f32.mrb[16].mxu1 }
 0x112   : > { %v1709_v63 = vpack.c.bf16 %v1906_v61, %v1905_v53  ;;  %v614_v0 = vpop.f32.mrb[19].mxu0  ;;  %v1210_v13 = vmul.f32 %v1906_v61, %v1906_v61  ;;  %v2350_v49 = vpop.f32.mrb[17].mxu1 }
 0x113   : > { %v1270_v3 = vadd.f32 %v1269_v60, %v1207_v59  ;;  %v1704_v4 = vpack.c.bf16 %v614_v0, %v611_v56  ;;  %v1138_v5 = vadd.f32 %v1137_v58, %v614_v0  ;;  %v1208_v6 = vmul.f32 %v614_v0, %v614_v0  ;;  %v2352_v54 = vpop.f32.mrb[18].mxu1 }
 0x114   : > { %1829 = vst [vmem:[%s2278_s6 + $0x48] sm:$0xff] %v1709_v63   ;;  %v1789_v59 = vpack.c.bf16 %v2352_v54, %v2348_v47  ;;  %v2356_v60 = vpop.f32.mrb[19].mxu1 }
 0x115   : > { %1828 = vst [vmem:[%s2278_s6 + $0x40] sm:$0xff] %v1704_v4   ;;  %v1139_v11 = vadd.f32 %v1905_v53, %v1138_v5  ;;  %v1271_v12 = vadd.f32 %v1270_v3, %v1208_v6  ;;  %v1784_v3 = vpack.c.bf16 %v2356_v60, %v2350_v49 }
 0x116   : > { %1845 = vst [vmem:[%s2278_s6 + $0xc8] sm:$0xff] %v1789_v59  }
 0x117   : > { %v1272_v15 = vadd.f32 %v1271_v12, %v1209_v10  ;;  %v1909_v16 = vpop.f32.mrb[20].mxu0  ;;  %v1140_v17 = vadd.f32 %v1906_v61, %v1139_v11  ;;  %1844 = vst [vmem:[%s2278_s6 + $0xc0] sm:$0xff] %v1784_v3  }
 0x118   : > { %v627_v20 = vpop.f32.mrb[21].mxu0  ;;  %v1213_v39 = vmul.f32 %v1909_v16, %v1909_v16 }
 0x119   : > { %v1141_v22 = vadd.f32 %v1140_v17, %v627_v20  ;;  %v1211_v23 = vmul.f32 %v627_v20, %v627_v20  ;;  %v1273_v24 = vadd.f32 %v1272_v15, %v1210_v13  ;;  %v1910_v25 = vpop.f32.mrb[22].mxu0  ;;  %v2364_v13 = vpop.f32.mrb[20].mxu1 }
 0x11a   : > { %v1719_v27 = vpack.c.bf16 %v1910_v25, %v1909_v16  ;;  %v630_v28 = vpop.f32.mrb[23].mxu0  ;;  %v1214_v43 = vmul.f32 %v1910_v25, %v1910_v25 }
 0x11b   : > { %v1274_v32 = vadd.f32 %v1273_v24, %v1211_v23  ;;  %v1714_v34 = vpack.c.bf16 %v630_v28, %v627_v20  ;;  %v1142_v35 = vadd.f32 %v1141_v22, %v630_v28  ;;  %v1212_v36 = vmul.f32 %v630_v28, %v630_v28 }
 0x11c   : > { %1831 = vst [vmem:[%s2278_s6 + $0x58] sm:$0xff] %v1719_v27  }
 0x11d   : > { %1830 = vst [vmem:[%s2278_s6 + $0x50] sm:$0xff] %v1714_v34   ;;  %v1143_v40 = vadd.f32 %v1909_v16, %v1142_v35  ;;  %v1275_v41 = vadd.f32 %v1274_v32, %v1212_v36  ;;  %v2366_v16 = vpop.f32.mrb[21].mxu1 }
 0x11e   : > { %v2368_v24 = vpop.f32.mrb[22].mxu1 }
 0x11f   : > { %v1276_v44 = vadd.f32 %v1275_v41, %v1213_v39  ;;  %v1913_v45 = vpop.f32.mrb[24].mxu0  ;;  %v1144_v46 = vadd.f32 %v1910_v25, %v1143_v40  ;;  %v1799_v28 = vpack.c.bf16 %v2368_v24, %v2364_v13  ;;  %v2372_v29 = vpop.f32.mrb[23].mxu1 }
 0x120   : > { %v643_v48 = vpop.f32.mrb[25].mxu0  ;;  %v1217_v4 = vmul.f32 %v1913_v45, %v1913_v45  ;;  %v1794_v37 = vpack.c.bf16 %v2372_v29, %v2366_v16 }
 0x121   : > { %v1145_v50 = vadd.f32 %v1144_v46, %v643_v48  ;;  %v1215_v51 = vmul.f32 %v643_v48, %v643_v48  ;;  %v1277_v52 = vadd.f32 %v1276_v44, %v1214_v43  ;;  %v1914_v53 = vpop.f32.mrb[26].mxu0  ;;  %1847 = vst [vmem:[%s2278_s6 + $0xd8] sm:$0xff] %v1799_v28   ;;  %v1223_v46 = vmul.f32 %v2286_v9, %v2286_v9 }
 0x122   : > { %v1729_v56 = vpack.c.bf16 %v1914_v53, %v1913_v45  ;;  %v646_v58 = vpop.f32.mrb[27].mxu0  ;;  %v1218_v8 = vmul.f32 %v1914_v53, %v1914_v53  ;;  %1846 = vst [vmem:[%s2278_s6 + $0xd0] sm:$0xff] %v1794_v37  }
 0x123   : > { %v1278_v61 = vadd.f32 %v1277_v52, %v1215_v51  ;;  %v1724_v63 = vpack.c.bf16 %v646_v58, %v643_v48  ;;  %v1146_v0 = vadd.f32 %v1145_v50, %v646_v58  ;;  %v1216_v1 = vmul.f32 %v646_v58, %v646_v58  ;;  %v2382_v48 = vpop.f32.mrb[24].mxu1 }
 0x124   : > { %1833 = vst [vmem:[%s2278_s6 + $0x68] sm:$0xff] %v1729_v56   ;;  %v2384_v50 = vpop.f32.mrb[25].mxu1 }
 0x125   : > { %1832 = vst [vmem:[%s2278_s6 + $0x60] sm:$0xff] %v1724_v63   ;;  %v1147_v5 = vadd.f32 %v1913_v45, %v1146_v0  ;;  %v1279_v6 = vadd.f32 %v1278_v61, %v1216_v1  ;;  %v1224_v63 = vmul.f32 %v2292_v18, %v2292_v18 }
 0x127   : > { %v1280_v10 = vadd.f32 %v1279_v6, %v1217_v4  ;;  %v1917_v11 = vpop.f32.mrb[28].mxu0  ;;  %v1148_v12 = vadd.f32 %v1914_v53, %v1147_v5  ;;  %v2387_v53 = vpop.f32.mrb[26].mxu1  ;;  %v1226_v4 = vmul.f32 %v2288_v14, %v2288_v14 }
 0x128   : > { %v659_v15 = vpop.f32.mrb[29].mxu0  ;;  %v1221_v39 = vmul.f32 %v1917_v11, %v1917_v11  ;;  %v1809_v56 = vpack.c.bf16 %v2387_v53, %v2382_v48  ;;  %v2391_v58 = vpop.f32.mrb[27].mxu1 }
 0x129   : > { %v1149_v17 = vadd.f32 %v1148_v12, %v659_v15  ;;  %v1219_v20 = vmul.f32 %v659_v15, %v659_v15  ;;  %v1281_v22 = vadd.f32 %v1280_v10, %v1218_v8  ;;  %v1918_v23 = vpop.f32.mrb[30].mxu0  ;;  %v1804_v0 = vpack.c.bf16 %v2391_v58, %v2384_v50  ;;  %v2408_v8 = vpop.f32.mrb[28].mxu1 }
 0x12a   : > { %v1739_v25 = vpack.c.bf16 %v1918_v23, %v1917_v11  ;;  %v662_v27 = vpop.f32.mrb[31].mxu0  ;;  %v1222_v43 = vmul.f32 %v1918_v23, %v1918_v23  ;;  %1849 = vst [vmem:[%s2278_s6 + $0xe8] sm:$0xff] %v1809_v56   ;;  %v2412_v10 = vpop.f32.mrb[29].mxu1 }
 0x12b   : > { %v1282_v32 = vadd.f32 %v1281_v22, %v1219_v20  ;;  %v1734_v34 = vpack.c.bf16 %v662_v27, %v659_v15  ;;  %v1150_v35 = vadd.f32 %v1149_v17, %v662_v27  ;;  %v1220_v36 = vmul.f32 %v662_v27, %v662_v27  ;;  %1848 = vst [vmem:[%s2278_s6 + $0xe0] sm:$0xff] %v1804_v0   ;;  %v2415_v12 = vpop.f32.mrb[30].mxu1 }
 0x12c   : > { %1835 = vst [vmem:[%s2278_s6 + $0x78] sm:$0xff] %v1739_v25   ;;  %v2419_v15 = vpop.f32.mrb[31].mxu1  ;;  %v1228_v20 = vmul.f32 %v2308_v42, %v2308_v42 }
 0x12d   : > { %1834 = vst [vmem:[%s2278_s6 + $0x70] sm:$0xff] %v1734_v34   ;;  %v1151_v40 = vadd.f32 %v1917_v11, %v1150_v35  ;;  %v1283_v41 = vadd.f32 %v1282_v32, %v1220_v36  ;;  %v1814_v22 = vpack.c.bf16 %v2419_v15, %v2412_v10 }
 0x12f   : > { %v1284_v44 = vadd.f32 %v1283_v41, %v1221_v39  ;;  %v1152_v45 = vadd.f32 %v1918_v23, %v1151_v40  ;;  %v1229_v23 = vmul.f32 %v2300_v31, %v2300_v31  ;;  %1850 = vst [vmem:[%s2278_s6 + $0xf0] sm:$0xff] %v1814_v22  }
 0x131   : > { %v1153_v51 = vadd.f32 %v1152_v45, %v2286_v9  ;;  %v1285_v52 = vadd.f32 %v1284_v44, %v1222_v43  ;;  %v1225_v9 = vmul.f32 %v2284_v7, %v2284_v7 }
 0x133   : > { %v1286_v59 = vadd.f32 %v1285_v52, %v1223_v46  ;;  %v1154_v61 = vadd.f32 %v1153_v51, %v2292_v18  ;;  %v1227_v18 = vmul.f32 %v2302_v33, %v2302_v33 }
 0x135   : > { %v1155_v1 = vadd.f32 %v2284_v7, %v1154_v61  ;;  %v1287_v3 = vadd.f32 %v1286_v59, %v1224_v63 }
 0x137   : > { %v1288_v5 = vadd.f32 %v1287_v3, %v1225_v9  ;;  %v1156_v6 = vadd.f32 %v2288_v14, %v1155_v1  ;;  %v1819_v14 = vpack.c.bf16 %v2415_v12, %v2408_v8 }
 0x139   : > { %v1157_v7 = vadd.f32 %v1156_v6, %v2302_v33  ;;  %v1289_v11 = vadd.f32 %v1288_v5, %v1226_v4  ;;  %1851 = vst [vmem:[%s2278_s6 + $0xf8] sm:$0xff] %v1819_v14  }
 0x13b   : > { %v1290_v33 = vadd.f32 %v1289_v11, %v1227_v18  ;;  %v1158_v17 = vadd.f32 %v1157_v7, %v2308_v42 }
 0x13d   : > { %v1159_v25 = vadd.f32 %v2300_v31, %v1158_v17  ;;  %v1291_v27 = vadd.f32 %v1290_v33, %v1228_v20 }
 0x13e   : > { %2045 = shalt.err (!%p2042_p3)
}
 0x13f   : > { %s2046_s26 = scalar_lea.hbm %s2424_s11, 4096  ;;  %s2050_s29 = scalar_lea.hbm %s2587_s2, 8192 }
 0x140   : > { %p2047_p4 = scmp.ne.s32.totalorder %s2424_s11, %s2046_s26  ;;  %p2051_p9 = scmp.lt.u32.totalorder %s2424_s11, %s2587_s2 }
 0x141   : > { %p2052_p10 = scmp.lt.u32.totalorder %s2050_s29, %s2046_s26  ;;  %p2054_p12 = scmp.lt.u32.totalorder %s2046_s26, %s2424_s11 }
 0x142   : > { %p2048_p7 = pnand %p2047_p4, %p2191_p5 }
 0x143   : > { %p2053_p11 = por %p2052_p10, %p2051_p9 }
 0x144   : > { %p2049_p8 = pneg %p2048_p7 }
 0x145   : > { %p2055_p13 = por %p2054_p12, %p2053_p11 }
 0x147   : > { %p2056_p0 = pnand %p2055_p13, %p2049_p8 }
 0x149   : > { %2059 = shalt.err (!%p2056_p0)
}
 0x14a   : > { %s2130_s6 = smov 64   ;;  %s2131_s7 = smov 4   ;;  %v1230_v31 = vmul.f32 %v2304_v38, %v2304_v38  ;;  %v1292_v42 = vadd.f32 %v1291_v27, %v1229_v23  ;;  %v1160_v28 = vadd.f32 %v2304_v38, %v1159_v25  ;;  %v1231_v32 = vmul.f32 %v2318_v57, %v2318_v57 }
 0x14b   : > { %1953 = dma.vmem_to_hbm [thread:$0]  (%p2191_p5), %s2426_s8, 4096, %s2424_s11, %s1328_s17, %s2130_s6, %s2130_s6, %s2131_s7   ;;  %v1232_v39 = vmul.f32 %v2324_v2, %v2324_v2  ;;  %v1233_v40 = vmul.f32 %v2316_v55, %v2316_v55  ;;  %v1234_v38 = vmul.f32 %v2320_v62, %v2320_v62  ;;  %v1236_v56 = vmul.f32 %v2340_v30, %v2340_v30 }
 0x14c   : > { %v1161_v34 = vadd.f32 %v1160_v28, %v2318_v57  ;;  %v1293_v35 = vadd.f32 %v1292_v42, %v1230_v31  ;;  %v1235_v57 = vmul.f32 %v2334_v21, %v2334_v21  ;;  %v1240_v4 = vmul.f32 %v2356_v60, %v2356_v60  ;;  %s1458_s8 = sshll.u32 %s2275_s4, 1  ;;  %s1593_s9 = sshll.u32 %s2174_s16, 5 }
 0x14d   : > { %v1244_v17 = vmul.f32 %v2372_v29, %v2372_v29  ;;  %v1248_v28 = vmul.f32 %v2391_v58, %v2391_v58  ;;  %s175_s10 = scalar_lea.vmem [#allocation4], %s1458_s8  ;;  %vm1324_vm3 = vcmask 1040384   ;;  %s2542_s20 = scalar_lea.hbm %s2588_s3, %s1593_s9 }
 0x14e   : > { %v1294_v36 = vadd.f32 %v1293_v35, %v1231_v32  ;;  %v1162_v37 = vadd.f32 %v1161_v34, %v2324_v2  ;;  %s1362_s11 = sshll.u32 %s175_s10, 4  ;;  %s1333_s24 = scalar_lea.sflag [#allocation5], %s2275_s4  ;;  %s2544_s11 = int_to_ptr.vmem [resolvable:$true] %s1362_s11 }
 0x14f   : > { %s2060_s25 = scalar_lea.vmem %s2544_s11, 32  ;;  %s2132_s16 = smov [#allocation4]  }
 0x150   : > { %v1163_v41 = vadd.f32 %v2316_v55, %v1162_v37  ;;  %v1295_v43 = vadd.f32 %v1294_v36, %v1232_v39  ;;  %v1237_v55 = vmul.f32 %v2332_v19, %v2332_v19  ;;  %p2061_p1 = scmp.ne.s32.totalorder %s2544_s11, %s2060_s25  ;;  %s2064_s26 = sshll.u32 %s2132_s16, 4  ;;  %s2065_s26 = int_to_ptr.vmem [resolvable:$false] %s2064_s26 }
 0x151   : > { %s2066_s27 = scalar_lea.vmem %s2065_s26, 64  ;;  %p2067_p4 = scmp.lt.s32.totalorder %s2544_s11, %s2065_s26 }
 0x152   : > { %v1296_v44 = vadd.f32 %v1295_v43, %v1233_v40  ;;  %v1164_v45 = vadd.f32 %v2320_v62, %v1163_v41  ;;  %v1238_v62 = vmul.f32 %v2336_v26, %v2336_v26  ;;  %v1253_v41 = vmul.f32 %v2408_v8, %v2408_v8  ;;  %p2062_p2 = pnand %p2061_p1, %p2191_p5  ;;  %p2068_p7 = scmp.lt.s32.totalorder %s2066_s27, %s2060_s25 }
 0x154   : > { %v1165_v46 = vadd.f32 %v1164_v45, %v2334_v21  ;;  %v1297_v51 = vadd.f32 %v1296_v44, %v1234_v38  ;;  %v1239_v21 = vmul.f32 %v2350_v49, %v2350_v49  ;;  %p2063_p3 = pneg %p2062_p2  ;;  %p2069_p8 = por %p2068_p7, %p2067_p4 }
 0x156   : > { %v1298_v52 = vadd.f32 %v1297_v51, %v1235_v57  ;;  %v1166_v2 = vadd.f32 %v1165_v46, %v2340_v30  ;;  %p2070_p9 = pnand %p2069_p8, %p2063_p3 }
 0x158   : > { %v1167_v59 = vadd.f32 %v2332_v19, %v1166_v2  ;;  %v1299_v61 = vadd.f32 %v1298_v52, %v1236_v56  ;;  %v1241_v19 = vmul.f32 %v2348_v47, %v2348_v47 }
 0x15a   : > { %v1300_v63 = vadd.f32 %v1299_v61, %v1237_v55  ;;  %v1168_v0 = vadd.f32 %v2336_v26, %v1167_v59  ;;  %v1242_v26 = vmul.f32 %v2352_v54, %v2352_v54 }
 0x15c   : > { %v1169_v9 = vadd.f32 %v1168_v0, %v2350_v49  ;;  %v1301_v1 = vadd.f32 %v1300_v63, %v1238_v62  ;;  %v1243_v49 = vmul.f32 %v2366_v16, %v2366_v16 }
 0x15e   : > { %v1302_v3 = vadd.f32 %v1301_v1, %v1239_v21  ;;  %v1170_v30 = vadd.f32 %v1169_v9, %v2356_v60 }
 0x160   : > { %v1171_v5 = vadd.f32 %v2348_v47, %v1170_v30  ;;  %v1303_v6 = vadd.f32 %v1302_v3, %v1240_v4  ;;  %v1245_v47 = vmul.f32 %v2364_v13, %v2364_v13 }
 0x162   : > { %v1304_v18 = vadd.f32 %v1303_v6, %v1241_v19  ;;  %v1172_v7 = vadd.f32 %v2352_v54, %v1171_v5  ;;  %v1246_v54 = vmul.f32 %v2368_v24, %v2368_v24 }
 0x164   : > { %v1173_v11 = vadd.f32 %v1172_v7, %v2366_v16  ;;  %v1305_v14 = vadd.f32 %v1304_v18, %v1242_v26  ;;  %v1247_v16 = vmul.f32 %v2384_v50, %v2384_v50 }
 0x166   : > { %v1306_v33 = vadd.f32 %v1305_v14, %v1243_v49  ;;  %v1174_v60 = vadd.f32 %v1173_v11, %v2372_v29 }
 0x168   : > { %v1175_v20 = vadd.f32 %v2364_v13, %v1174_v60  ;;  %v1307_v22 = vadd.f32 %v1306_v33, %v1244_v17  ;;  %v1249_v13 = vmul.f32 %v2382_v48, %v2382_v48 }
 0x16a   : > { %v1308_v23 = vadd.f32 %v1307_v22, %v1245_v47  ;;  %v1176_v25 = vadd.f32 %v2368_v24, %v1175_v20  ;;  %v1250_v24 = vmul.f32 %v2387_v53, %v2387_v53 }
 0x16c   : > { %v1177_v27 = vadd.f32 %v1176_v25, %v2384_v50  ;;  %v1309_v31 = vadd.f32 %v1308_v23, %v1246_v54  ;;  %v1251_v50 = vmul.f32 %v2412_v10, %v2412_v10 }
 0x16e   : > { %v1310_v42 = vadd.f32 %v1309_v31, %v1247_v16  ;;  %v1178_v29 = vadd.f32 %v1177_v27, %v2391_v58 }
 0x170   : > { %v1179_v32 = vadd.f32 %v2382_v48, %v1178_v29  ;;  %v1311_v34 = vadd.f32 %v1310_v42, %v1248_v28  ;;  %v1252_v48 = vmul.f32 %v2419_v15, %v2419_v15 }
 0x172   : > { %v1312_v35 = vadd.f32 %v1311_v34, %v1249_v13  ;;  %v1180_v36 = vadd.f32 %v2387_v53, %v1179_v32  ;;  %v1254_v53 = vmul.f32 %v2415_v12, %v2415_v12 }
 0x174   : > { %v1181_v37 = vadd.f32 %v1180_v36, %v2412_v10  ;;  %v1313_v39 = vadd.f32 %v1312_v35, %v1250_v24 }
 0x176   : > { %v1314_v58 = vadd.f32 %v1313_v39, %v1251_v50  ;;  %v1182_v40 = vadd.f32 %v1181_v37, %v2419_v15 }
 0x178   : > { %v1183_v43 = vadd.f32 %v2408_v8, %v1182_v40  ;;  %v1315_v38 = vadd.f32 %v1314_v58, %v1252_v48 }
 0x17a   : > { %v1184_v10 = vadd.f32 %v2415_v12, %v1183_v43  ;;  %v1316_v44 = vadd.f32 %v1315_v38, %v1253_v41 }
 0x17c   : > { %v1185_v45 = vrot.slane %v1184_v10, 4  ;;  %v1317_v57 = vadd.f32 %v1316_v44, %v1254_v53 }
 0x17e   : > { %v1186_v46 = vadd.f32 %v1185_v45, %v1184_v10  ;;  %v1318_v51 = vrot.slane %v1317_v57, 4 }
 0x180   : > { %v1187_v52 = vrot.slane %v1186_v46, 2  ;;  %v1319_v2 = vadd.f32 %v1318_v51, %v1317_v57 }
 0x182   : > { %v1188_v15 = vadd.f32 %v1187_v52, %v1186_v46  ;;  %v1320_v56 = vrot.slane %v1319_v2, 2 }
 0x184   : > { %v1189_v55 = vrot.slane %v1188_v15, 1  ;;  %v1321_v8 = vadd.f32 %v1320_v56, %v1319_v2 }
 0x186   : > { %v1322_v59 = vrot.slane %v1321_v8, 1  ;;  %v1190_v12 = vadd.f32 %v1189_v55, %v1188_v15 }
 0x188   : > { %v1323_v61 = vadd.f32 %v1322_v59, %v1321_v8 }
 0x18a   : > { %v1325_v62 = vsel %vm1324_vm3, %v1190_v12, %v1323_v61 }
 0x18b   : > { %1326 = vst [vmem:[%s175_s10] sm:$0x3] %v1325_v62 }
 0x18c   : > { %2073 = shalt.err (!%p2070_p9)
}
 0x18d   : > { %s2074_s4 = scalar_lea.hbm %s2542_s20, 32  ;;  %s2078_s30 = scalar_lea.hbm %s2588_s3, 64 }
 0x18e   : > { %p2075_p10 = scmp.ne.s32.totalorder %s2542_s20, %s2074_s4  ;;  %p2079_p13 = scmp.lt.u32.totalorder %s2542_s20, %s2588_s3 }
 0x18f   : > { %p2080_p0 = scmp.lt.u32.totalorder %s2078_s30, %s2074_s4  ;;  %p2082_p2 = scmp.lt.u32.totalorder %s2074_s4, %s2542_s20 }
 0x190   : > { %p2076_p11 = pnand %p2075_p10, %p2191_p5 }
 0x191   : > { %p2081_p1 = por %p2080_p0, %p2079_p13 }
 0x192   : > { %p2077_p12 = pneg %p2076_p11 }
 0x193   : > { %p2083_p3 = por %p2082_p2, %p2081_p1 }
 0x195   : > { %p2084_p4 = pnand %p2083_p3, %p2077_p12 }
 0x197   : > { %2087 = shalt.err (!%p2084_p4)
}
 0x198   : > { %1954 = dma.vmem_to_hbm [thread:$0]  (%p2191_p5), %s2544_s11, 32, %s2542_s20, %s1333_s24  }
 0x199 PF: > { %p1964_p7 = scmp.ge.s32.totalorder %s2126_s15, 2  ;;  %s1374_s7 = sand.u32 1, %s2114_s12  }
 0x19a   : > { %s1375_s8 = scalar_lea.sflag [#allocation3], %s1374_s7 }
 0x19b   : > { %p1958_p8 = pnand %p1964_p7, %p2195_p6 }
 0x19d   : > { %2105 = dma.done.wait (!%p1958_p8), %s1375_s8, 4096  }
 0x19e   : > { %2107 = vsyncadd (!%p1958_p8), %s1375_s8, 4294963200  ;;  %s1384_s9 = scalar_lea.sflag [#allocation5], %s1374_s7 }
 0x19f   : > { %2109 = dma.done.wait (!%p1958_p8), %s1384_s9, 32  }
 0x1a0   : > { %2111 = vsyncadd (!%p1958_p8), %s1384_s9, 4294967264  ;;  %p17_p5 = scmp.ge.s32.totalorder %s2178_s18, 4   ;;  %s2591_s12 = smov %s2118_s13 }
 0x1a1   : > { %s2592_s13 = smov %s2122_s14  ;;  %s2593_s14 = smov %s2189_s21 }
 0x1a2   : > { %s2594_s15 = smov %s2178_s18  ;;  %19 = sbr.rel (!%p17_p5) target bundleno = 5 (0x5), region = 80 }
 0x1a9   :  { %1389 = vsyncpa [#allocation3], 1 }
 0x1aa   :  { %1391 = vsyncpa [#allocation3 + $0x1], 1 }
 0x1ab   :  { %1392 = vsyncpa [#allocation5], 1 }
 0x1ac   :  { %1394 = vsyncpa [#allocation5 + $0x1], 1 }

</bundles_post_ra>
